<compile_context>
chip_gen: v7x
topology: tpu7x:2x2x1
jax: 0.10.0
libtpu: 0.0.40
codegen_flags: <defaults>
</compile_context>

<pallas_src>
import math

import jax
import jax.numpy as jnp
from jax import lax
from jax.experimental import pallas as pl
from jax.experimental.pallas import tpu as pltpu


def _round_up(x, m):
    return ((x + m - 1) // m) * m


def _pick_tile(dim, candidates):
    for c in candidates:
        if dim % c == 0:
            return c
    return dim


# ---------------------------------------------------------------------------
# Fused matmul + bias kernel (used for the concatenated q/k/v 1x1 projection)
# ---------------------------------------------------------------------------
def _matmul_bias_kernel(a_ref, b_ref, bias_ref, o_ref, acc_ref):
    k = pl.program_id(2)

    @pl.when(k == 0)
    def _():
        acc_ref[...] = jnp.zeros_like(acc_ref)

    acc_ref[...] += jnp.dot(a_ref[...], b_ref[...],
                            preferred_element_type=jnp.float32)

    @pl.when(k == pl.num_programs(2) - 1)
    def _():
        o_ref[...] = (acc_ref[...] + bias_ref[...]).astype(o_ref.dtype)


@jax.jit
def matmul_bias(a, b, bias):
    """(M,K) @ (K,N) + bias.  bf16 MXU operands, f32 accumulation/output."""
    M, K = a.shape
    K2, N = b.shape
    assert K == K2 and bias.shape == (N,)

    M_pad = _round_up(M, 128)
    K_pad = _round_up(K, 128)
    N_pad = _round_up(N, 128)

    a_p = jnp.pad(a.astype(jnp.bfloat16), ((0, M_pad - M), (0, K_pad - K)))
    b_p = jnp.pad(b.astype(jnp.bfloat16), ((0, K_pad - K), (0, N_pad - N)))
    bias_p = jnp.pad(bias.astype(jnp.float32), (0, N_pad - N)).reshape(1, N_pad)

    tm = _pick_tile(M_pad, (256, 128))
    tn = _pick_tile(N_pad, (512, 256, 128))
    tk = _pick_tile(K_pad, (512, 256, 128))

    out = pl.pallas_call(
        _matmul_bias_kernel,
        out_shape=jax.ShapeDtypeStruct((M_pad, N_pad), jnp.float32),
        grid=(M_pad // tm, N_pad // tn, K_pad // tk),
        in_specs=[
            pl.BlockSpec((tm, tk), lambda i, j, k: (i, k)),
            pl.BlockSpec((tk, tn), lambda i, j, k: (k, j)),
            pl.BlockSpec((1, tn), lambda i, j, k: (0, j)),
        ],
        out_specs=pl.BlockSpec((tm, tn), lambda i, j, k: (i, j)),
        scratch_shapes=[pltpu.VMEM((tm, tn), jnp.float32)],
        compiler_params=pltpu.CompilerParams(
            dimension_semantics=("parallel", "parallel", "arbitrary"),
            vmem_limit_bytes=64 * 1024 * 1024,
        ),
    )(a_p, b_p, bias_p)
    return out[:M, :N]


# ---------------------------------------------------------------------------
# Attention core with fused residual:  out = x + scale * (softmax(q k^T) @ v)
# (B, N, C) layout: C is the lane axis, so loads/stores are lane-dense.
# ---------------------------------------------------------------------------
def _attn_residual_kernel(scale_ref, q_ref, k_ref, v_ref, x_ref, o_ref):
    q = q_ref[0].astype(jnp.bfloat16)          # (N, Cq)
    k = k_ref[0].astype(jnp.bfloat16)          # (N, Cq)
    v = v_ref[0].astype(jnp.bfloat16)          # (N, C)
    # s[n, m] = q_n . k_m   == torch.bmm(query_out, key_out)
    s = lax.dot_general(q, k, (((1,), (1,)), ((), ())),
                        preferred_element_type=jnp.float32)       # (N, N)
    s = s - jnp.max(s, axis=-1, keepdims=True)
    e = jnp.exp(s)
    inv = pl.reciprocal(jnp.sum(e, axis=-1, keepdims=True), approx=True)
    p = (e * inv).astype(jnp.bfloat16)                            # softmax(dim=-1)
    o = jnp.dot(p, v, preferred_element_type=jnp.float32)         # (N, C)
    o_ref[0] = x_ref[0] + scale_ref[0] * o


@jax.jit
def attention_residual(scale, q, k, v, x_bnc):
    B, N, Cq = q.shape
    C = v.shape[-1]
    return pl.pallas_call(
        _attn_residual_kernel,
        out_shape=jax.ShapeDtypeStruct((B, N, C), jnp.float32),
        grid=(B,),
        in_specs=[
            pl.BlockSpec(memory_space=pltpu.MemorySpace.SMEM),        # scale (1,)
            pl.BlockSpec((1, N, Cq), lambda b: (b, 0, 0)),
            pl.BlockSpec((1, N, Cq), lambda b: (b, 0, 0)),
            pl.BlockSpec((1, N, C), lambda b: (b, 0, 0)),
            pl.BlockSpec((1, N, C), lambda b: (b, 0, 0)),
        ],
        out_specs=pl.BlockSpec((1, N, C), lambda b: (b, 0, 0)),
        compiler_params=pltpu.CompilerParams(
            dimension_semantics=("parallel",)),
    )(scale, q, k, v, x_bnc)


# ---------------------------------------------------------------------------
# Module forward (matches SelfAttention.forward)
# ---------------------------------------------------------------------------
def self_attention_forward(x_nchw, params, *, temperature=0.0, mode=False):
    B, C, H, W = x_nchw.shape
    N = H * W
    Cq = C // 8

    if (not mode) and temperature == 0.0:
        # out = x + attn_out * 0  ==  x exactly; skip the dead compute.
        return x_nchw

    scale = (params["gamma"] if mode
             else jnp.full((1,), temperature)).astype(jnp.float32)

    x_bnc = jnp.transpose(x_nchw, (0, 2, 3, 1)).reshape(B, N, C).astype(jnp.float32)

    # Fused q/k/v 1x1-conv projection: single matmul over [wq | wk | wv].
    qkv = matmul_bias(x_bnc.reshape(B * N, C), params["w_qkv"], params["b_qkv"])
    qkv = qkv.reshape(B, N, 2 * Cq + C)
    q = qkv[..., :Cq]
    k = qkv[..., Cq:2 * Cq]
    v = qkv[..., 2 * Cq:]

    out_bnc = attention_residual(scale, q, k, v, x_bnc)
    return jnp.transpose(out_bnc.reshape(B, H, W, C), (0, 3, 1, 2)).astype(x_nchw.dtype)


# ---------------------------------------------------------------------------
# Pure-JAX reference (mirrors the PyTorch module exactly) + params
# ---------------------------------------------------------------------------
def self_attention_ref(x, params, *, temperature=0.0, mode=False):
    B, C, H, W = x.shape
    N = H * W

    def conv1x1(w_io, b):  # w_io: (Cin, Cout)
        return jnp.einsum('bchw,co->bohw', x, w_io) + b[None, :, None, None]

    q = conv1x1(params["wq"], params["bq"]).reshape(B, -1, N).transpose(0, 2, 1)
    k = conv1x1(params["wk"], params["bk"]).reshape(B, -1, N)
    attn = jax.nn.softmax(jnp.einsum('bnc,bcm->bnm', q, k), axis=-1)
    v = conv1x1(params["wv"], params["bv"]).reshape(B, -1, N)
    out = jnp.einsum('bcm,bnm->bcn', v, attn).reshape(B, C, H, W)
    scale = params["gamma"][0] if mode else temperature
    return x + out * scale


def init_params(key, in_dim):
    Cq = in_dim // 8
    k1, k2, k3, k4, k5, k6 = jax.random.split(key, 6)
    wq = jax.random.normal(k1, (in_dim, Cq), jnp.float32) / math.sqrt(in_dim)
    wk = jax.random.normal(k2, (in_dim, Cq), jnp.float32) / math.sqrt(in_dim)
    wv = jax.random.normal(k3, (in_dim, in_dim), jnp.float32) / math.sqrt(in_dim)
    bq = jax.random.normal(k4, (Cq,), jnp.float32) * 0.05
    bk = jax.random.normal(k5, (Cq,), jnp.float32) * 0.05
    bv = jax.random.normal(k6, (in_dim,), jnp.float32) * 0.05
    return dict(
        wq=wq, bq=bq, wk=wk, bk=bk, wv=wv, bv=bv,
        w_qkv=jnp.concatenate([wq, wk, wv], axis=1),       # (C, Cq+Cq+C)
        b_qkv=jnp.concatenate([bq, bk, bv], axis=0),
        gamma=jnp.zeros((1,), jnp.float32),                # nn.Parameter(torch.zeros(1))
    )


# ---------------------------------------------------------------------------
if __name__ == "__main__":
    root = jax.random.PRNGKey(0)
    pkey, xkey = jax.random.split(root)

    B, C, H, W = 2, 128, 8, 8          # in_dim must be divisible by 8
    params = init_params(pkey, C)
    x = jax.random.normal(xkey, (B, C, H, W), jnp.float32)

    # Exercise the kernels with a non-zero temperature (module.set_temperature(0.5)).
    temperature = 0.5
    out = self_attention_forward(x, params, temperature=temperature, mode=False)
    out = jax.block_until_ready(out)
    assert out.shape == (B, C, H, W), out.shape
    assert bool(jnp.all(jnp.isfinite(out)))

    ref = self_attention_ref(x, params, temperature=temperature, mode=False)
    max_abs_err = float(jnp.max(jnp.abs(out - ref)))
    assert max_abs_err < 8e-2, f"mismatch vs reference: max abs err {max_abs_err}"

    # Default module configuration (temperature=0.0, mode=False) is identity.
    out0 = jax.block_until_ready(self_attention_forward(x, params))
    assert bool(jnp.all(out0 == x))

    print("KERNEL_OK")
</pallas_src>

<mosaic_0001>
module attributes {stable_mosaic.version = 11 : i64} {
  func.func @_matmul_bias_kernel(%arg0: i32, %arg1: i32, %arg2: i32, %arg3: memref<128x128xbf16, #tpu.memory_space<vmem>>, %arg4: memref<128x256xbf16, #tpu.memory_space<vmem>>, %arg5: memref<1x256xf32, #tpu.memory_space<vmem>>, %arg6: memref<128x256xf32, #tpu.memory_space<vmem>>, %arg7: memref<128x256xf32, #tpu.memory_space<vmem>>) attributes {dimension_semantics = [#tpu.dimension_semantics<parallel>, #tpu.dimension_semantics<parallel>, #tpu.dimension_semantics<arbitrary>], iteration_bounds = array<i64: 1, 1, 1>, scalar_prefetch = 0 : i64, scratch_operands = 1 : i64, tpu.core_type = #tpu.core_type<tc>, window_params = [{transform_indices = @transform_0, window_bounds = array<i64: 128, 128>}, {transform_indices = @transform_1, window_bounds = array<i64: 128, 256>}, {transform_indices = @transform_2, window_bounds = array<i64: 1, 256>}, {transform_indices = @transform_3, window_bounds = array<i64: 128, 256>}]} {
    %c0_i32 = arith.constant 0 : i32
    %0 = arith.cmpi eq, %arg2, %c0_i32 : i32
    %1 = arith.extui %0 : i1 to i32
    %c0_i32_0 = arith.constant 0 : i32
    %2 = arith.cmpi ne, %1, %c0_i32_0 : i32
    scf.if %2 {
      %cst_10 = arith.constant 0.000000e+00 : f32
      %12 = vector.broadcast %cst_10 : f32 to vector<128x256xf32>
      %c0_11 = arith.constant 0 : index
      %c0_12 = arith.constant 0 : index
      %13 = vector.load %arg7[%c0_11, %c0_12] : memref<128x256xf32, #tpu.memory_space<vmem>>, vector<128x256xf32>
      tpu.vector_store %arg7[%c0_11, %c0_12], %12 {strides = array<i32>} : memref<128x256xf32, #tpu.memory_space<vmem>>, vector<128x256xf32>,
    } else {
    }
    %c0 = arith.constant 0 : index
    %c0_1 = arith.constant 0 : index
    %3 = vector.load %arg7[%c0, %c0_1] : memref<128x256xf32, #tpu.memory_space<vmem>>, vector<128x256xf32>
    %c0_2 = arith.constant 0 : index
    %c0_3 = arith.constant 0 : index
    %4 = vector.load %arg3[%c0_2, %c0_3] : memref<128x128xbf16, #tpu.memory_space<vmem>>, vector<128x128xbf16>
    %c0_4 = arith.constant 0 : index
    %c0_5 = arith.constant 0 : index
    %5 = vector.load %arg4[%c0_4, %c0_5] : memref<128x256xbf16, #tpu.memory_space<vmem>>, vector<128x256xbf16>
    %cst = arith.constant dense<0.000000e+00> : vector<128x256xf32>
    %6 = tpu.matmul %4, %5, %cst {dimension_numbers = #tpu.dot_dimension_numbers<[1], [0], [0], [1], [0, 0, 1, 1], [], []>} : vector<128x128xbf16>, vector<128x256xbf16>, vector<128x256xf32> -> vector<128x256xf32>
    %7 = arith.addf %3, %6 : vector<128x256xf32>
    %c0_6 = arith.constant 0 : index
    %c0_7 = arith.constant 0 : index
    %8 = vector.load %arg7[%c0_6, %c0_7] : memref<128x256xf32, #tpu.memory_space<vmem>>, vector<128x256xf32>
    tpu.vector_store %arg7[%c0_6, %c0_7], %7 {strides = array<i32>} : memref<128x256xf32, #tpu.memory_space<vmem>>, vector<128x256xf32>,
    %c0_i32_8 = arith.constant 0 : i32
    %9 = arith.cmpi eq, %arg2, %c0_i32_8 : i32
    %10 = arith.extui %9 : i1 to i32
    %c0_i32_9 = arith.constant 0 : i32
    %11 = arith.cmpi ne, %10, %c0_i32_9 : i32
    scf.if %11 {
      %c0_10 = arith.constant 0 : index
      %c0_11 = arith.constant 0 : index
      %12 = vector.load %arg7[%c0_10, %c0_11] : memref<128x256xf32, #tpu.memory_space<vmem>>, vector<128x256xf32>
      %c0_12 = arith.constant 0 : index
      %c0_13 = arith.constant 0 : index
      %13 = vector.load %arg5[%c0_12, %c0_13] : memref<1x256xf32, #tpu.memory_space<vmem>>, vector<1x256xf32>
      %14 = vector.broadcast %13 : vector<1x256xf32> to vector<128x256xf32>
      %15 = arith.addf %12, %14 : vector<128x256xf32>
      %c0_14 = arith.constant 0 : index
      %c0_15 = arith.constant 0 : index
      %16 = vector.load %arg6[%c0_14, %c0_15] : memref<128x256xf32, #tpu.memory_space<vmem>>, vector<128x256xf32>
      tpu.vector_store %arg6[%c0_14, %c0_15], %15 {strides = array<i32>} : memref<128x256xf32, #tpu.memory_space<vmem>>, vector<128x256xf32>,
    } else {
    }
    return
  }
  func.func @transform_0(%arg0: i32, %arg1: i32, %arg2: i32) -> (i32, i32) {
    %c0_i32 = arith.constant 0 : i32
    return %arg0, %arg2 : i32, i32
  }
  func.func @transform_1(%arg0: i32, %arg1: i32, %arg2: i32) -> (i32, i32) {
    %c0_i32 = arith.constant 0 : i32
    return %arg2, %arg1 : i32, i32
  }
  func.func @transform_2(%arg0: i32, %arg1: i32, %arg2: i32) -> (i32, i32) {
    %c0_i32 = arith.constant 0 : i32
    %c0_i32_0 = arith.constant 0 : i32
    return %c0_i32, %arg1 : i32, i32
  }
  func.func @transform_3(%arg0: i32, %arg1: i32, %arg2: i32) -> (i32, i32) {
    %c0_i32 = arith.constant 0 : i32
    return %arg0, %arg1 : i32, i32
  }
}

</mosaic_0001>

<bundles_post_ra>
// kernel: matmul_bias.1
= control target key start
LH: loop header
LB: loop body
LE: loop exit
PB: predicated region body
PF: predicated region fallthrough
CT: control target
= control target key end

     0   :  { %8 = vsyncpa [#allocation4], 0  ;;  %s889_s0 = inlined_call_operand.hbm [shape: bf16[128,128], index: 0, kind: input, shape index: {}]   ;;  %s890_s1 = inlined_call_operand.hbm [shape: bf16[128,256], index: 1, kind: input, shape index: {}]   ;;  %s891_s2 = inlined_call_operand.hbm [shape: f32[1,256], index: 2, kind: input, shape index: {}]   ;;  %s892_s3 = inlined_call_operand.hbm [shape: f32[128,256], index: 3, kind: output, shape index: {}]  }
   0x1   :  { %9 = vsyncpa [#allocation7], 0 }
   0x2   :  { %10 = vsyncpa [#allocation5], 0  ;;  %s766_s12 = smov [#allocation6]   ;;  %s672_s16 = scalar_lea.hbm %s890_s1, 2048 }
   0x3   :  { %s28_s13 = sshll.u32 %s766_s12, 4  ;;  %p673_p0 = scmp.ne.s32.totalorder %s890_s1, %s672_s16  ;;  %s29_s13 = int_to_ptr.vmem [resolvable:$true] %s28_s13 }
   0x4   :  { %p676_p1 = scmp.lt.u32.totalorder %s672_s16, %s890_s1 }
   0x6   :  { %p678_p2 = pnand %p676_p1, %p673_p0 }
   0x8   :  { %681 = shalt.err (!%p678_p2)
}
   0x9   :  { %s682_s21 = scalar_lea.vmem %s29_s13, 2048  ;;  %p687_p4 = scmp.lt.s32.totalorder %s29_s13, %s29_s13 }
   0xa   :  { %p683_p3 = scmp.ne.s32.totalorder %s29_s13, %s682_s21  ;;  %p688_p5 = scmp.lt.s32.totalorder %s682_s21, %s682_s21 }
   0xc   :  { %p689_p6 = por %p688_p5, %p687_p4 }
   0xe   :  { %p690_p7 = pnand %p689_p6, %p683_p3 }
  0x10   :  { %693 = shalt.err (!%p690_p7)
}
  0x11   :  { %s767_s22 = smov 128   ;;  %s768_s23 = smov 8  }
  0x12   :  { %34 = dma.hbm_to_vmem [thread:$0]  %s890_s1, 2048, %s29_s13, [#allocation7], %s767_s22, %s767_s22, %s768_s23  }
  0x13   :  { %s769_s26 = smov [#allocation3]   ;;  %s694_s30 = scalar_lea.hbm %s889_s0, 1024 }
  0x14   :  { %s16_s27 = sshll.u32 %s769_s26, 4  ;;  %p695_p8 = scmp.ne.s32.totalorder %s889_s0, %s694_s30  ;;  %s17_s27 = int_to_ptr.vmem [resolvable:$true] %s16_s27 }
  0x15   :  { %p698_p9 = scmp.lt.u32.totalorder %s694_s30, %s889_s0 }
  0x17   :  { %p700_p10 = pnand %p698_p9, %p695_p8 }
  0x19   :  { %703 = shalt.err (!%p700_p10)
}
  0x1a   :  { %s704_s8 = scalar_lea.vmem %s17_s27, 1024  ;;  %p709_p12 = scmp.lt.s32.totalorder %s17_s27, %s17_s27 }
  0x1b   :  { %p705_p11 = scmp.ne.s32.totalorder %s17_s27, %s704_s8  ;;  %p710_p13 = scmp.lt.s32.totalorder %s704_s8, %s704_s8 }
  0x1d   :  { %p711_p0 = por %p710_p13, %p709_p12 }
  0x1f   :  { %p712_p1 = pnand %p711_p0, %p705_p11 }
  0x21   :  { %715 = shalt.err (!%p712_p1)
}
  0x22   :  { %s770_s1 = smov 64   ;;  %s771_s9 = smov 4  }
  0x23   :  { %22 = dma.hbm_to_vmem [thread:$0]  %s889_s0, 1024, %s17_s27, [#allocation4], %s770_s1, %s770_s1, %s771_s9  }
  0x24   :  { %s772_s12 = smov [#allocation8]   ;;  %s716_s16 = scalar_lea.hbm %s891_s2, 32 }
  0x25   :  { %s41_s13 = sshll.u32 %s772_s12, 4  ;;  %p717_p2 = scmp.ne.s32.totalorder %s891_s2, %s716_s16  ;;  %s42_s13 = int_to_ptr.vmem [resolvable:$true] %s41_s13 }
  0x26   :  { %p720_p3 = scmp.lt.u32.totalorder %s716_s16, %s891_s2 }
  0x28   :  { %p722_p4 = pnand %p720_p3, %p717_p2 }
  0x2a   :  { %725 = shalt.err (!%p722_p4)
}
  0x2b   :  { %s726_s21 = scalar_lea.vmem %s42_s13, 32  ;;  %p731_p6 = scmp.lt.s32.totalorder %s42_s13, %s42_s13 }
  0x2c   :  { %p727_p5 = scmp.ne.s32.totalorder %s42_s13, %s726_s21  ;;  %p732_p7 = scmp.lt.s32.totalorder %s726_s21, %s726_s21 }
  0x2e   :  { %p733_p8 = por %p732_p7, %p731_p6 }
  0x30   :  { %p734_p9 = pnand %p733_p8, %p727_p5 }
  0x32   :  { %737 = shalt.err (!%p734_p9)
}
  0x33   :  { %44 = dma.hbm_to_vmem [thread:$0]  %s891_s2, 32, %s42_s13, [#allocation7]  }
  0x34   :  { %760 = dma.done.wait [#allocation4], 1024  }
  0x35   :  { %761 = vsyncadd [#allocation4], 4294966272 }
  0x36   :  { %762 = dma.done.wait [#allocation7], 2080  }
  0x37   :  { %763 = vsyncadd [#allocation7], 4294965216  ;;  %v773_v0 = vmov 0   ;;  %v640_v1 = vld [vmem:[#allocation6 + $0x4] ss:$8 sps:$4 sm:$0xff]   ;;  %v668_v21 = vld [vmem:[#allocation3 + $0x10] sm:$0xff]   ;;  %v497_v25 = vlaneseq }
  0x38   :  { %315 = vmatprep.mubr.bf16.mxu0 %v773_v0  ;;  %355 = vmatprep.mubr.bf16.mxu1 %v773_v0  ;;  %v642_v2 = vld [vmem:[#allocation6] ss:$8 sps:$4 sm:$0xff]   ;;  %v643_v3 = vld [vmem:[#allocation6 + $0x14] ss:$8 sps:$4 sm:$0xff]   ;;  %v645_v4 = vld [vmem:[#allocation6 + $0x10] ss:$8 sps:$4 sm:$0xff]  }
  0x39   :  { %283 = vmatprep.subr.bf16.mxu0 %v640_v1  ;;  %613 = vmatprep.subr.bf16.mxu1 %v640_v1  ;;  %v646_v5 = vld [vmem:[#allocation6 + $0x24] ss:$8 sps:$4 sm:$0xff]   ;;  %v648_v6 = vld [vmem:[#allocation6 + $0x20] ss:$8 sps:$4 sm:$0xff]   ;;  %v649_v7 = vld [vmem:[#allocation6 + $0x34] ss:$8 sps:$4 sm:$0xff]  }
  0x3a   :  { %284 = vmatpush1.bf16.msra.mxu0 %v642_v2  ;;  %621 = vmatpush1.bf16.msra.mxu1 %v642_v2  ;;  %v651_v8 = vld [vmem:[#allocation6 + $0x30] ss:$8 sps:$4 sm:$0xff]   ;;  %v652_v9 = vld [vmem:[#allocation6 + $0x44] ss:$8 sps:$4 sm:$0xff]   ;;  %v654_v10 = vld [vmem:[#allocation6 + $0x40] ss:$8 sps:$4 sm:$0xff]  }
  0x3b   :  { %285 = vmatprep.subr.bf16.mxu0 %v643_v3  ;;  %614 = vmatprep.subr.bf16.mxu1 %v643_v3  ;;  %v655_v11 = vld [vmem:[#allocation6 + $0x54] ss:$8 sps:$4 sm:$0xff]   ;;  %v657_v12 = vld [vmem:[#allocation6 + $0x50] ss:$8 sps:$4 sm:$0xff]   ;;  %v658_v13 = vld [vmem:[#allocation6 + $0x64] ss:$8 sps:$4 sm:$0xff]  }
  0x3c   :  { %v660_v14 = vld [vmem:[#allocation6 + $0x60] ss:$8 sps:$4 sm:$0xff]   ;;  %v661_v15 = vld [vmem:[#allocation6 + $0x74] ss:$8 sps:$4 sm:$0xff]   ;;  %v663_v16 = vld [vmem:[#allocation6 + $0x70] ss:$8 sps:$4 sm:$0xff]  }
  0x3d   :  { %v664_v17 = vld [vmem:[#allocation3] sm:$0xff]   ;;  %v666_v19 = vld [vmem:[#allocation3 + $0x8] sm:$0xff]   ;;  %v669_v22 = vld [vmem:[#allocation3 + $0x30] sm:$0xff]   ;;  %v498_v26 = vshrl.u32 %v497_v25, 7  ;;  %s774_s2 = smov [#allocation9]  }
  0x3e   :  { %286 = vmatpush1.bf16.msra.mxu0 %v645_v4  ;;  %622 = vmatpush1.bf16.msra.mxu1 %v645_v4  ;;  %v665_v18 = vld [vmem:[#allocation3 + $0x20] sm:$0xff]   ;;  %v667_v20 = vld [vmem:[#allocation3 + $0x28] sm:$0xff]   ;;  %v670_v23 = vld [vmem:[#allocation3 + $0x18] sm:$0xff]   ;;  %s576_s23 = sshll.u32 %s774_s2, 4  ;;  %s577_s23 = int_to_ptr.vmem [resolvable:$true] %s576_s23 }
  0x3f   :  { %287 = vmatprep.subr.bf16.mxu0 %v646_v5  ;;  %615 = vmatprep.subr.bf16.mxu1 %v646_v5  ;;  %v671_v24 = vld [vmem:[#allocation3 + $0x38] sm:$0xff]   ;;  %v499_v27 = vsub.s32 0, %v498_v26  ;;  %v495_v28 = vld [vmem:[#allocation8] sm:$0x3]  ;;  %v503_v29 = vsub.s32 1, %v498_v26  ;;  %s738_s24 = scalar_lea.vmem %s577_s23, 4096  ;;  %p743_p11 = scmp.lt.s32.totalorder %s577_s23, %s577_s23 }
  0x40   :  { %p739_p10 = scmp.ne.s32.totalorder %s577_s23, %s738_s24  ;;  %p744_p12 = scmp.lt.s32.totalorder %s738_s24, %s738_s24 }
  0x41   :  { %v841_v30 = vrot.slane %v495_v28, %v499_v27  ;;  %v843_v31 = vrot.slane %v495_v28, %v503_v29 }
  0x42   :  { %288 = vmatpush1.bf16.msra.mxu0 %v648_v6  ;;  %623 = vmatpush1.bf16.msra.mxu1 %v648_v6  ;;  %p745_p13 = por %p744_p12, %p743_p11 }
  0x43   :  { %289 = vmatprep.subr.bf16.mxu0 %v649_v7  ;;  %616 = vmatprep.subr.bf16.mxu1 %v649_v7 }
  0x44   :  { %p746_p0 = pnand %p745_p13, %p739_p10 }
  0x46   :  { %290 = vmatpush1.bf16.msra.mxu0 %v651_v8  ;;  %624 = vmatpush1.bf16.msra.mxu1 %v651_v8 }
  0x47   :  { %291 = vmatprep.subr.bf16.mxu0 %v652_v9  ;;  %617 = vmatprep.subr.bf16.mxu1 %v652_v9 }
  0x4a   :  { %292 = vmatpush1.bf16.msra.mxu0 %v654_v10  ;;  %625 = vmatpush1.bf16.msra.mxu1 %v654_v10 }
  0x4b   :  { %293 = vmatprep.subr.bf16.mxu0 %v655_v11  ;;  %618 = vmatprep.subr.bf16.mxu1 %v655_v11 }
  0x4e   :  { %294 = vmatpush1.bf16.msra.mxu0 %v657_v12  ;;  %626 = vmatpush1.bf16.msra.mxu1 %v657_v12 }
  0x4f   :  { %295 = vmatprep.subr.bf16.mxu0 %v658_v13  ;;  %619 = vmatprep.subr.bf16.mxu1 %v658_v13 }
  0x52   :  { %296 = vmatpush1.bf16.msra.mxu0 %v660_v14  ;;  %627 = vmatpush1.bf16.msra.mxu1 %v660_v14 }
  0x53   :  { %297 = vmatprep.subr.bf16.mxu0 %v661_v15  ;;  %620 = vmatprep.subr.bf16.mxu1 %v661_v15 }
  0x56   :  { %298 = vmatpush1.bf16.msra.mxu0 %v663_v16  ;;  %628 = vmatpush1.bf16.msra.mxu1 %v663_v16 }
  0x59   :  { %316 = vmatmul.mubr.bf16.vlgmr.msra.gmra.mrb[0].mxu0 %v664_v17  ;;  %356 = vmatmul.mubr.bf16.vlgmr.msra.gmra.mrb[0].mxu1 %v665_v18 }
  0x5a   :  { %325 = vmatprep.mubr.bf16.mxu0 %v773_v0  ;;  %365 = vmatprep.mubr.bf16.mxu1 %v773_v0 }
  0x61   :  { %326 = vmatmul.mubr.bf16.gmra.mrb[4].mxu0 %v666_v19  ;;  %366 = vmatmul.mubr.bf16.gmra.mrb[4].mxu1 %v667_v20 }
  0x62   :  { %335 = vmatprep.mubr.bf16.mxu0 %v773_v0  ;;  %375 = vmatprep.mubr.bf16.mxu1 %v773_v0 }
  0x69   :  { %336 = vmatmul.mubr.bf16.gmra.mrb[8].mxu0 %v668_v21  ;;  %376 = vmatmul.mubr.bf16.gmra.mrb[8].mxu1 %v669_v22 }
  0x6a   :  { %345 = vmatprep.mubr.bf16.mxu0 %v773_v0  ;;  %385 = vmatprep.mubr.bf16.mxu1 %v773_v0 }
  0x71   :  { %346 = vmatmul.mubr.bf16.gmra.mrb[12].mxu0 %v670_v23  ;;  %386 = vmatmul.mubr.bf16.gmra.mrb[12].mxu1 %v671_v24 }
 0x12c   :  { %v317_v32 = vpop.f32.mrb[0].mxu0  ;;  %v357_v33 = vpop.f32.mrb[0].mxu1 }
 0x12d   :  { %v507_v34 = vadd.f32 %v841_v30, %v317_v32  ;;  %v523_v35 = vadd.f32 %v841_v30, %v357_v33  ;;  %v319_v36 = vpop.f32.mrb[1].mxu0  ;;  %v359_v37 = vpop.f32.mrb[1].mxu1 }
 0x12e   :  { %v508_v38 = vadd.f32 %v843_v31, %v319_v36  ;;  %v524_v39 = vadd.f32 %v843_v31, %v359_v37  ;;  %v321_v40 = vpop.f32.mrb[2].mxu0  ;;  %v361_v41 = vpop.f32.mrb[2].mxu1 }
 0x12f   :  { %539 = vst [vmem:[#allocation9] sm:$0xff] %v507_v34  ;;  %555 = vst [vmem:[#allocation9 + $0x80] sm:$0xff] %v523_v35  ;;  %v509_v42 = vadd.f32 %v841_v30, %v321_v40  ;;  %v525_v43 = vadd.f32 %v841_v30, %v361_v41  ;;  %v323_v44 = vpop.f32.mrb[3].mxu0  ;;  %v363_v45 = vpop.f32.mrb[3].mxu1 }
 0x130   :  { %540 = vst [vmem:[#allocation9 + $0x8] sm:$0xff] %v508_v38  ;;  %556 = vst [vmem:[#allocation9 + $0x88] sm:$0xff] %v524_v39  ;;  %v510_v46 = vadd.f32 %v843_v31, %v323_v44  ;;  %v526_v47 = vadd.f32 %v843_v31, %v363_v45 }
 0x131   :  { %541 = vst [vmem:[#allocation9 + $0x10] sm:$0xff] %v509_v42  ;;  %557 = vst [vmem:[#allocation9 + $0x90] sm:$0xff] %v525_v43 }
 0x132   :  { %542 = vst [vmem:[#allocation9 + $0x18] sm:$0xff] %v510_v46  ;;  %558 = vst [vmem:[#allocation9 + $0x98] sm:$0xff] %v526_v47 }
 0x134   :  { %v327_v48 = vpop.f32.mrb[4].mxu0  ;;  %v367_v49 = vpop.f32.mrb[4].mxu1 }
 0x135   :  { %v511_v50 = vadd.f32 %v841_v30, %v327_v48  ;;  %v527_v51 = vadd.f32 %v841_v30, %v367_v49  ;;  %v329_v52 = vpop.f32.mrb[5].mxu0  ;;  %v369_v53 = vpop.f32.mrb[5].mxu1 }
 0x136   :  { %v512_v54 = vadd.f32 %v843_v31, %v329_v52  ;;  %v528_v55 = vadd.f32 %v843_v31, %v369_v53  ;;  %v331_v56 = vpop.f32.mrb[6].mxu0  ;;  %v371_v57 = vpop.f32.mrb[6].mxu1 }
 0x137   :  { %543 = vst [vmem:[#allocation9 + $0x20] sm:$0xff] %v511_v50  ;;  %559 = vst [vmem:[#allocation9 + $0xa0] sm:$0xff] %v527_v51  ;;  %v513_v58 = vadd.f32 %v841_v30, %v331_v56  ;;  %v529_v59 = vadd.f32 %v841_v30, %v371_v57  ;;  %v333_v60 = vpop.f32.mrb[7].mxu0  ;;  %v373_v61 = vpop.f32.mrb[7].mxu1 }
 0x138   :  { %544 = vst [vmem:[#allocation9 + $0x28] sm:$0xff] %v512_v54  ;;  %560 = vst [vmem:[#allocation9 + $0xa8] sm:$0xff] %v528_v55  ;;  %v514_v62 = vadd.f32 %v843_v31, %v333_v60  ;;  %v530_v63 = vadd.f32 %v843_v31, %v373_v61 }
 0x139   :  { %545 = vst [vmem:[#allocation9 + $0x30] sm:$0xff] %v513_v58  ;;  %561 = vst [vmem:[#allocation9 + $0xb0] sm:$0xff] %v529_v59 }
 0x13a   :  { %546 = vst [vmem:[#allocation9 + $0x38] sm:$0xff] %v514_v62  ;;  %562 = vst [vmem:[#allocation9 + $0xb8] sm:$0xff] %v530_v63 }
 0x13c   :  { %v337_v0 = vpop.f32.mrb[8].mxu0  ;;  %v377_v1 = vpop.f32.mrb[8].mxu1 }
 0x13d   :  { %v515_v2 = vadd.f32 %v841_v30, %v337_v0  ;;  %v531_v3 = vadd.f32 %v841_v30, %v377_v1  ;;  %v339_v4 = vpop.f32.mrb[9].mxu0  ;;  %v379_v5 = vpop.f32.mrb[9].mxu1 }
 0x13e   :  { %v516_v6 = vadd.f32 %v843_v31, %v339_v4  ;;  %v532_v7 = vadd.f32 %v843_v31, %v379_v5  ;;  %v341_v8 = vpop.f32.mrb[10].mxu0  ;;  %v381_v9 = vpop.f32.mrb[10].mxu1 }
 0x13f   :  { %547 = vst [vmem:[#allocation9 + $0x40] sm:$0xff] %v515_v2  ;;  %563 = vst [vmem:[#allocation9 + $0xc0] sm:$0xff] %v531_v3  ;;  %v517_v10 = vadd.f32 %v841_v30, %v341_v8  ;;  %v533_v11 = vadd.f32 %v841_v30, %v381_v9  ;;  %v343_v12 = vpop.f32.mrb[11].mxu0  ;;  %v383_v13 = vpop.f32.mrb[11].mxu1 }
 0x140   :  { %548 = vst [vmem:[#allocation9 + $0x48] sm:$0xff] %v516_v6  ;;  %564 = vst [vmem:[#allocation9 + $0xc8] sm:$0xff] %v532_v7  ;;  %v518_v14 = vadd.f32 %v843_v31, %v343_v12  ;;  %v534_v15 = vadd.f32 %v843_v31, %v383_v13 }
 0x141   :  { %549 = vst [vmem:[#allocation9 + $0x50] sm:$0xff] %v517_v10  ;;  %565 = vst [vmem:[#allocation9 + $0xd0] sm:$0xff] %v533_v11 }
 0x142   :  { %550 = vst [vmem:[#allocation9 + $0x58] sm:$0xff] %v518_v14  ;;  %566 = vst [vmem:[#allocation9 + $0xd8] sm:$0xff] %v534_v15 }
 0x144   :  { %v347_v16 = vpop.f32.mrb[12].mxu0  ;;  %v387_v17 = vpop.f32.mrb[12].mxu1 }
 0x145   :  { %v519_v18 = vadd.f32 %v841_v30, %v347_v16  ;;  %v535_v19 = vadd.f32 %v841_v30, %v387_v17  ;;  %v349_v20 = vpop.f32.mrb[13].mxu0  ;;  %v389_v21 = vpop.f32.mrb[13].mxu1 }
 0x146   :  { %v520_v22 = vadd.f32 %v843_v31, %v349_v20  ;;  %v536_v23 = vadd.f32 %v843_v31, %v389_v21  ;;  %v351_v24 = vpop.f32.mrb[14].mxu0  ;;  %v391_v25 = vpop.f32.mrb[14].mxu1 }
 0x147   :  { %551 = vst [vmem:[#allocation9 + $0x60] sm:$0xff] %v519_v18  ;;  %567 = vst [vmem:[#allocation9 + $0xe0] sm:$0xff] %v535_v19  ;;  %v521_v26 = vadd.f32 %v841_v30, %v351_v24  ;;  %v537_v27 = vadd.f32 %v841_v30, %v391_v25  ;;  %v353_v28 = vpop.f32.mrb[15].mxu0  ;;  %v393_v29 = vpop.f32.mrb[15].mxu1 }
 0x148   :  { %552 = vst [vmem:[#allocation9 + $0x68] sm:$0xff] %v520_v22  ;;  %568 = vst [vmem:[#allocation9 + $0xe8] sm:$0xff] %v536_v23  ;;  %v522_v32 = vadd.f32 %v843_v31, %v353_v28  ;;  %v538_v33 = vadd.f32 %v843_v31, %v393_v29 }
 0x149   :  { %553 = vst [vmem:[#allocation9 + $0x70] sm:$0xff] %v521_v26  ;;  %569 = vst [vmem:[#allocation9 + $0xf0] sm:$0xff] %v537_v27 }
 0x14a   :  { %554 = vst [vmem:[#allocation9 + $0x78] sm:$0xff] %v522_v32  ;;  %570 = vst [vmem:[#allocation9 + $0xf8] sm:$0xff] %v538_v33 }
 0x14b   :  { %749 = shalt.err (!%p746_p0)
}
 0x14c   :  { %s750_s27 = scalar_lea.hbm %s892_s3, 4096 }
 0x14d   :  { %p751_p1 = scmp.ne.s32.totalorder %s892_s3, %s750_s27  ;;  %p754_p2 = scmp.lt.u32.totalorder %s750_s27, %s892_s3 }
 0x14f   :  { %p756_p3 = pnand %p754_p2, %p751_p1 }
 0x151   :  { %759 = shalt.err (!%p756_p3)
}
 0x152   :  { %s775_s5 = smov 256   ;;  %s776_s6 = smov 16  }
 0x153   :  { %582 = dma.vmem_to_hbm [thread:$0]  %s577_s23, 4096, %s892_s3, [#allocation5], %s775_s5, %s775_s5, %s776_s6  }
 0x154   :  { %764 = dma.done.wait [#allocation5], 4096  }
 0x155   :  { %765 = vsyncadd [#allocation5], 4294963200 }
 0x156   :  { %586 = vsyncpa [#allocation4], 1 }
 0x157   :  { %587 = vsyncpa [#allocation7], 1 }
 0x158   :  { %588 = vsyncpa [#allocation5], 1 }

</bundles_post_ra>
